<compile_context>
chip_gen: v5e
topology: v5e:2x2
jax: 0.10.0
libtpu: 0.0.40
codegen_flags: <defaults>
</compile_context>

<pallas_src>
import functools

import jax
import jax.numpy as jnp
from jax import lax
from jax.experimental import pallas as pl
from jax.experimental.pallas import tpu as pltpu


def _gram_kernel(x_ref, y_ref, o_ref, *, d, tk, tiles_per_core, mask_needed):
    """Accumulate one feature-tile contribution of K = Z @ Z.T.

    Grid = (core, feature_tile).  The output block index depends only on the
    core axis, so each core's (1, n, n) f32 slab stays resident in VMEM across
    the reduction axis and serves as the accumulator directly.
    """
    c = pl.program_id(0)
    k = pl.program_id(1)

    @pl.when(k == 0)
    def _():
        o_ref[...] = jnp.zeros_like(o_ref)

    # Build the (2B, tk) Z-tile in VMEM only — the concat never touches HBM.
    z = jnp.concatenate([x_ref[...], y_ref[...]], axis=0)

    if mask_needed:  # static: only emitted when the tiled span overruns D
        g = c * tiles_per_core + k  # global feature-tile index
        col = g * tk + lax.broadcasted_iota(jnp.int32, z.shape, 1)
        z = jnp.where(col < d, z, jnp.zeros_like(z))

    # Contract both operands on axis 1: the MXU consumes the RHS transposed
    # natively — no materialized z.T, no per-step XLU transpose.
    o_ref[...] += lax.dot_general(
        z, z,
        dimension_numbers=(((1,), (1,)), ((), ())),
        preferred_element_type=jnp.float32,
    )[None]


def _choose_tk(n_rows, d, itemsize, target_block_bytes, max_tk=512 * 1024):
    """Feature-tile width: multiple of 128, ~target_block_bytes per step."""
    tk = target_block_bytes // max(1, n_rows * itemsize)
    tk = max(128, (tk // 128) * 128)
    tk = min(tk, max_tk)
    if d <= tk:
        return int(d)  # single tile covering the full feature dim
    return int(tk)


def gram_matrix(X_flat, Y_flat, *, target_block_bytes=4 * 1024 * 1024):
    """K = [X;Y] @ [X;Y].T via Pallas, without materializing the concat."""
    bx, d = X_flat.shape
    by, dy = Y_flat.shape
    assert d == dy, "feature dims must match"
    n = bx + by
    itemsize = max(X_flat.dtype.itemsize, Y_flat.dtype.itemsize)

    tk = _choose_tk(n, d, itemsize, target_block_bytes)
    num_tiles = -(-d // tk)
    # Split the reduction across v7x's two TensorCores when there is work to
    # split; on v5e/v6e the size-2 "parallel" axis just runs serially.
    num_cores = 2 if num_tiles >= 2 else 1
    tiles_per_core = -(-num_tiles // num_cores)
    total_tiles = num_cores * tiles_per_core
    mask_needed = total_tiles * tk > d
    last_tile = num_tiles - 1

    def in_map(c, k):
        g = c * tiles_per_core + k
        # Clamp fully-out-of-range tiles (odd tile counts) to a valid block;
        # the in-kernel mask zeroes their contribution.
        return (0, jnp.minimum(g, last_tile))

    # VMEM budget: double-buffered input blocks + in-VMEM concat/mask temps +
    # resident output slab, with 2x headroom, capped for v7x (64 MiB physical).
    block_in = 2 * n * tk * itemsize
    block_tmp = 2 * n * tk * max(itemsize, 4)
    need = block_in + block_tmp + n * n * 4
    vmem_limit = int(min(48 * 1024 * 1024, max(16 * 1024 * 1024, 2 * need)))

    out = pl.pallas_call(
        functools.partial(
            _gram_kernel, d=d, tk=tk,
            tiles_per_core=tiles_per_core, mask_needed=mask_needed),
        out_shape=jax.ShapeDtypeStruct((num_cores, n, n), jnp.float32),
        grid_spec=pltpu.PrefetchScalarGridSpec(
            num_scalar_prefetch=0,
            grid=(num_cores, tiles_per_core),
            in_specs=[
                pl.BlockSpec((bx, tk), in_map),
                pl.BlockSpec((by, tk), in_map),
            ],
            out_specs=pl.BlockSpec((1, n, n), lambda c, k: (c, 0, 0)),
        ),
        compiler_params=pltpu.CompilerParams(
            dimension_semantics=("parallel", "arbitrary"),
            vmem_limit_bytes=vmem_limit,
        ),
    )(X_flat, Y_flat)
    return out.sum(axis=0)


def kernel_loss(X, Y, kernel_type="linear", *, linear_fast_path=True,
                compute_dtype=None):
    """Pallas-backed equivalent of kernelLoss.forward."""
    B = X.shape[0]
    X_flat = X.reshape(B, -1)
    Y_flat = Y.reshape(Y.shape[0], -1)

    if kernel_type == "linear" and linear_fast_path:
        # MMD with a linear kernel is exactly ||mean(X_flat) - mean(Y_flat)||^2:
        # one streaming pass, no Gram matrix, no concat — HBM-roofline floor.
        diff = X_flat.mean(axis=0) - Y_flat.mean(axis=0)
        return jnp.dot(diff, diff, preferred_element_type=jnp.float32)

    if compute_dtype is not None:  # e.g. jnp.bfloat16 to halve HBM bytes
        X_flat = X_flat.astype(compute_dtype)
        Y_flat = Y_flat.astype(compute_dtype)

    K = gram_matrix(X_flat, Y_flat)  # (2B, 2B) f32 — the heavy Pallas compute

    # Cheap (2B, 2B) post-processing, matching the PyTorch sub-modules.
    if kernel_type == "linear":
        Km = K
    elif kernel_type == "polinominal":
        Km = (K + 1.0) ** 2
    else:
        sq = jnp.diag(K)
        L2 = jnp.maximum(sq[:, None] + sq[None, :] - 2.0 * K, 0.0)  # cdist**2
        if kernel_type == "gaussian":
            n_kernels, mul_factor = 5, 2.0
            mult = mul_factor ** (jnp.arange(n_kernels) - n_kernels // 2)
            n = L2.shape[0]
            bandwidth = L2.sum() / (n * n - n)
            Km = jnp.exp(-L2[None] / (bandwidth * mult)[:, None, None]).sum(0)
        elif kernel_type == "laplace":
            gammas = jnp.array([0.1, 1.0, 5.0], dtype=jnp.float32)
            Km = jnp.exp(-L2[None] * gammas[:, None, None]).sum(0)
        else:
            raise ValueError(f"unknown kernel_type: {kernel_type}")

    XX = Km[:B, :B].mean()
    XY = Km[:B, B:].mean()
    YY = Km[B:, B:].mean()
    return XX - 2.0 * XY + YY


if __name__ == "__main__":
    key = jax.random.PRNGKey(0)
    kx, ky = jax.random.split(key)
    # Small NCHW inputs consistent with the module: B=2, C=4, H=W=16 (D=1024).
    X = jax.random.normal(kx, (2, 4, 16, 16), dtype=jnp.float32)
    Y = jax.random.normal(ky, (2, 4, 16, 16), dtype=jnp.float32)

    # Plain-JAX reference mirroring the PyTorch kernelLoss with LinearKernel.
    Xf = X.reshape(2, -1)
    Yf = Y.reshape(2, -1)
    Zr = jnp.concatenate([Xf, Yf], axis=0)
    K_ref = Zr @ Zr.T
    ref = K_ref[:2, :2].mean() - 2.0 * K_ref[:2, 2:].mean() + K_ref[2:, 2:].mean()

    # 1) Pallas Gram path (exercises the pallas_call).
    loss_gram = kernel_loss(X, Y, "linear", linear_fast_path=False)
    jax.block_until_ready(loss_gram)
    assert jnp.allclose(loss_gram, ref, atol=1e-3, rtol=1e-4), (loss_gram, ref)

    # 2) Direct Gram-matrix check, single-tile path (tk == D).
    K = gram_matrix(Xf, Yf)
    jax.block_until_ready(K)
    assert K.shape == (4, 4)
    assert jnp.allclose(K, K_ref, atol=1e-4, rtol=1e-4)

    # 3) Multi-tile path: tiny tile target forces tk=384 -> 3 tiles over 2
    #    cores (ragged last tile masked, out-of-range tile clamped + zeroed).
    K_tiled = gram_matrix(Xf, Yf, target_block_bytes=6144)
    jax.block_until_ready(K_tiled)
    assert jnp.allclose(K_tiled, K_ref, atol=1e-4, rtol=1e-4)

    # 4) Linear fast path (algebraically identical MMD, no Gram matrix).
    loss_fast = kernel_loss(X, Y, "linear")
    jax.block_until_ready(loss_fast)
    assert jnp.allclose(loss_fast, ref, atol=1e-3, rtol=1e-4), (loss_fast, ref)

    print("KERNEL_OK")
</pallas_src>

<mosaic_0001>
module attributes {stable_mosaic.version = 11 : i64} {
  func.func @_gram_kernel(%arg0: i32, %arg1: i32, %arg2: memref<2x1024xf32, #tpu.memory_space<vmem>>, %arg3: memref<2x1024xf32, #tpu.memory_space<vmem>>, %arg4: memref<1x4x4xf32, #tpu.memory_space<vmem>>) attributes {dimension_semantics = [#tpu.dimension_semantics<parallel>, #tpu.dimension_semantics<arbitrary>], iteration_bounds = array<i64: 1, 1>, scalar_prefetch = 0 : i64, scratch_operands = 0 : i64, tpu.core_type = #tpu.core_type<tc>, window_params = [{transform_indices = @transform_0, window_bounds = array<i64: 2, 1024>}, {transform_indices = @transform_1, window_bounds = array<i64: 2, 1024>}, {transform_indices = @transform_2, window_bounds = array<i64: 1, 4, 4>}]} {
    %c0_i32 = arith.constant 0 : i32
    %0 = arith.cmpi eq, %arg1, %c0_i32 : i32
    %1 = arith.extui %0 : i1 to i32
    %c0_i32_0 = arith.constant 0 : i32
    %2 = arith.cmpi ne, %1, %c0_i32_0 : i32
    scf.if %2 {
      %cst_10 = arith.constant 0.000000e+00 : f32
      %11 = vector.broadcast %cst_10 : f32 to vector<1x4x4xf32>
      %c0_11 = arith.constant 0 : index
      %c0_12 = arith.constant 0 : index
      %c0_13 = arith.constant 0 : index
      %12 = vector.load %arg4[%c0_11, %c0_12, %c0_13] : memref<1x4x4xf32, #tpu.memory_space<vmem>>, vector<1x4x4xf32>
      tpu.vector_store %arg4[%c0_11, %c0_12, %c0_13], %11 {strides = array<i32>} : memref<1x4x4xf32, #tpu.memory_space<vmem>>, vector<1x4x4xf32>,
    } else {
    }
    %c0 = arith.constant 0 : index
    %c0_1 = arith.constant 0 : index
    %3 = vector.load %arg2[%c0, %c0_1] : memref<2x1024xf32, #tpu.memory_space<vmem>>, vector<2x1024xf32>
    %c0_2 = arith.constant 0 : index
    %c0_3 = arith.constant 0 : index
    %4 = vector.load %arg3[%c0_2, %c0_3] : memref<2x1024xf32, #tpu.memory_space<vmem>>, vector<2x1024xf32>
    %5 = tpu.concatenate %3, %4 in 0 : vector<2x1024xf32>, vector<2x1024xf32> -> vector<4x1024xf32>
    %c0_4 = arith.constant 0 : index
    %c0_5 = arith.constant 0 : index
    %c0_6 = arith.constant 0 : index
    %6 = vector.load %arg4[%c0_4, %c0_5, %c0_6] : memref<1x4x4xf32, #tpu.memory_space<vmem>>, vector<1x4x4xf32>
    %cst = arith.constant dense<0.000000e+00> : vector<4x4xf32>
    %7 = tpu.matmul %5, %5, %cst {dimension_numbers = #tpu.dot_dimension_numbers<[1], [1], [0], [0], [0, 0, 1, 0], [], []>} : vector<4x1024xf32>, vector<4x1024xf32>, vector<4x4xf32> -> vector<4x4xf32>
    %8 = vector.shape_cast %7 : vector<4x4xf32> to vector<1x4x4xf32>
    %9 = arith.addf %6, %8 : vector<1x4x4xf32>
    %c0_7 = arith.constant 0 : index
    %c0_8 = arith.constant 0 : index
    %c0_9 = arith.constant 0 : index
    %10 = vector.load %arg4[%c0_7, %c0_8, %c0_9] : memref<1x4x4xf32, #tpu.memory_space<vmem>>, vector<1x4x4xf32>
    tpu.vector_store %arg4[%c0_7, %c0_8, %c0_9], %9 {strides = array<i32>} : memref<1x4x4xf32, #tpu.memory_space<vmem>>, vector<1x4x4xf32>,
    return
  }
  func.func @transform_0(%arg0: i32, %arg1: i32) -> (i32, i32) {
    %c1_i32 = arith.constant 1 : i32
    %0 = arith.muli %arg0, %c1_i32 : i32
    %1 = arith.addi %0, %arg1 : i32
    %c0_i32 = arith.constant 0 : i32
    %2 = arith.minsi %1, %c0_i32 : i32
    %c0_i32_0 = arith.constant 0 : i32
    %c0_i32_1 = arith.constant 0 : i32
    return %c0_i32_0, %2 : i32, i32
  }
  func.func @transform_1(%arg0: i32, %arg1: i32) -> (i32, i32) {
    %c1_i32 = arith.constant 1 : i32
    %0 = arith.muli %arg0, %c1_i32 : i32
    %1 = arith.addi %0, %arg1 : i32
    %c0_i32 = arith.constant 0 : i32
    %2 = arith.minsi %1, %c0_i32 : i32
    %c0_i32_0 = arith.constant 0 : i32
    %c0_i32_1 = arith.constant 0 : i32
    return %c0_i32_0, %2 : i32, i32
  }
  func.func @transform_2(%arg0: i32, %arg1: i32) -> (i32, i32, i32) {
    %c0_i32 = arith.constant 0 : i32
    %c0_i32_0 = arith.constant 0 : i32
    %c0_i32_1 = arith.constant 0 : i32
    return %arg0, %c0_i32, %c0_i32_0 : i32, i32, i32
  }
}

</mosaic_0001>

<bundles_post_ra>
// kernel: tpu_custom_call.1
= control target key start
LH: loop header
LB: loop body
LE: loop exit
PB: predicated region body
PF: predicated region fallthrough
CT: control target
= control target key end

     0   :  { %7 = vsyncpa [#allocation3], 0  ;;  %s428_s0 = inlined_call_operand.hbm [shape: f32[2,1024], index: 0, kind: input, shape index: {}]   ;;  %s429_s1 = inlined_call_operand.hbm [shape: f32[2,1024], index: 1, kind: input, shape index: {}]   ;;  %s430_s2 = inlined_call_operand.hbm [shape: f32[1,4,4], index: 2, kind: output, shape index: {}]  }
   0x1   :  { %8 = vsyncpa [#allocation6], 0 }
   0x2   :  { %9 = vsyncpa [#allocation4], 0  ;;  %s21_s11 = sshll.u32 %s428_s0, 4  ;;  %s390_s12 = smov [#allocation2]   ;;  %s22_s11 = int_to_ptr.hbm [resolvable:$true] %s21_s11 }
   0x3   :  { %s23_s13 = sshll.u32 %s390_s12, 4  ;;  %s38_s16 = sshll.u32 %s429_s1, 4  ;;  %s24_s13 = int_to_ptr.vmem [resolvable:$true] %s23_s13  ;;  %s39_s16 = int_to_ptr.hbm [resolvable:$true] %s38_s16 }
   0x4   :  { %26 = dma.hbm_to_vmem [thread:$0]  %s22_s11, 256, %s24_s13, [#allocation3]  }
   0x5   :  { %s391_s17 = smov [#allocation5]  }
   0x6   :  { %s40_s18 = sshll.u32 %s391_s17, 4  ;;  %s41_s18 = int_to_ptr.vmem [resolvable:$true] %s40_s18 }
   0x7   :  { %43 = dma.hbm_to_vmem [thread:$0]  %s39_s16, 256, %s41_s18, [#allocation6]  }
   0x8   :  { %384 = dma.done.wait [#allocation3], 256  }
   0x9   :  { %385 = vsyncadd [#allocation3], 4294967040 }
   0xa   :  { %386 = dma.done.wait [#allocation6], 256  }
   0xb   :  { %387 = vsyncadd [#allocation6], 4294967040  ;;  %v66_v0 = vld [vmem:[#allocation2] sm:$0xff]  ;;  %v67_v1 = vld [vmem:[#allocation2 + $0x8] sm:$0xff]  ;;  %vm113_vm0 = vcmask 1041408   ;;  %vm64_vm1 = vcmask 27648  }
   0xc   :  { %72 = vst [vmem:[#allocation1] ss:$4 sm:$0xff] %v66_v0  ;;  %v68_v2 = vld [vmem:[#allocation5] sm:$0xff]  ;;  %v69_v7 = vld [vmem:[#allocation5 + $0x8] sm:$0xff]  ;;  %v392_v28 = vmov 0.0   ;;  %s393_s0 = smov [#allocation7]  }
   0xd   :  { %74 = vst [vmem:[#allocation1 + $0x20] ss:$4 sm:$0xff] %v67_v1  ;;  %s291_s1 = sshll.u32 %s393_s0, 4  ;;  %s293_s21 = sshll.u32 %s430_s2, 4  ;;  %s292_s1 = int_to_ptr.vmem [resolvable:$true] %s291_s1  ;;  %s294_s21 = int_to_ptr.hbm [resolvable:$true] %s293_s21 }
   0xe   :  { %65 = vst.msk [vmem:[#allocation7] sm:$0xf] %vm64_vm1, %v392_v28 }
  0x13   :  { %v75_v3 = vld.sshfl [vmem:[#allocation1] sm:$0xff pattern:$0x73625140]  ;;  %v76_v4 = vld.sshfl [vmem:[#allocation1 + $0x8] sm:$0xff pattern:$0x73625140] }
  0x14   :  { %v77_v5 = vld.sshfl [vmem:[#allocation1 + $0x10] sm:$0xff pattern:$0x73625140]  ;;  %v78_v6 = vld.sshfl [vmem:[#allocation1 + $0x18] sm:$0xff pattern:$0x73625140] }
  0x15   :  { %94 = vst [vmem:[#allocation1 + $0x1] ss:$4 sm:$0xff] %v68_v2  ;;  %v79_v8 = vld.sshfl [vmem:[#allocation1 + $0x20] sm:$0xff pattern:$0x73625140] }
  0x16   :  { %v80_v9 = vld.sshfl [vmem:[#allocation1 + $0x28] sm:$0xff pattern:$0x73625140]  ;;  %v81_v10 = vld.sshfl [vmem:[#allocation1 + $0x30] sm:$0xff pattern:$0x73625140] }
  0x17   :  { %v82_v11 = vld.sshfl [vmem:[#allocation1 + $0x38] sm:$0xff pattern:$0x73625140]  ;;  %v122_v42 = vld [vmem:[#allocation7] sm:$0xf] }
  0x18   :  { %96 = vst [vmem:[#allocation1 + $0x21] ss:$4 sm:$0xff] %v69_v7 }
  0x1c   :  { %v99_v12 = vld.sshfl [vmem:[#allocation1 + $0x10] sm:$0xff pattern:$0x73625140]  ;;  %v97_v13 = vld.sshfl [vmem:[#allocation1] sm:$0xff pattern:$0x73625140] }
  0x1d   :  { %v116_v14 = vsel %vm113_vm0, %v77_v5, %v99_v12  ;;  %v114_v15 = vsel %vm113_vm0, %v75_v3, %v97_v13  ;;  %v98_v16 = vld.sshfl [vmem:[#allocation1 + $0x8] sm:$0xff pattern:$0x73625140]  ;;  %v100_v17 = vld.sshfl [vmem:[#allocation1 + $0x18] sm:$0xff pattern:$0x73625140] }
  0x1e   :  { %178 = vmatpush.xpose.msra.mxu2 %v116_v14  ;;  %138 = vmatpush.xpose.msra.mxu0 %v114_v15  ;;  %v115_v18 = vsel %vm113_vm0, %v76_v4, %v98_v16  ;;  %v117_v19 = vsel %vm113_vm0, %v78_v6, %v100_v17 }
  0x1f   :  { %158 = vmatpush.xpose.msra.mxu1 %v115_v18  ;;  %198 = vmatpush.xpose.msra.mxu3 %v117_v19  ;;  %v103_v20 = vld.sshfl [vmem:[#allocation1 + $0x30] sm:$0xff pattern:$0x73625140]  ;;  %v101_v21 = vld.sshfl [vmem:[#allocation1 + $0x20] sm:$0xff pattern:$0x73625140] }
  0x20   :  { %v120_v22 = vsel %vm113_vm0, %v81_v10, %v103_v20  ;;  %v118_v23 = vsel %vm113_vm0, %v79_v8, %v101_v21  ;;  %v104_v24 = vld.sshfl [vmem:[#allocation1 + $0x38] sm:$0xff pattern:$0x73625140]  ;;  %v102_v25 = vld.sshfl [vmem:[#allocation1 + $0x28] sm:$0xff pattern:$0x73625140] }
  0x21   :  { %179 = vmatmul.f32.vlgmr.msra.gmra.mxu2 %v116_v14  ;;  %139 = vmatmul.f32.vlgmr.msra.gmra.mxu0 %v114_v15  ;;  %v121_v26 = vsel %vm113_vm0, %v82_v11, %v104_v24  ;;  %v119_v27 = vsel %vm113_vm0, %v80_v9, %v102_v25 }
  0x22   :  { %258 = vmatpush.xpose.msrb.mxu2 %v120_v22  ;;  %159 = vmatmul.f32.vlgmr.msra.gmra.mxu1 %v115_v18 }
  0x23   :  { %199 = vmatmul.f32.vlgmr.msra.gmra.mxu3 %v117_v19  ;;  %218 = vmatpush.xpose.msrb.mxu0 %v118_v23 }
  0x24   :  { %278 = vmatpush.xpose.msrb.mxu3 %v121_v26  ;;  %238 = vmatpush.xpose.msrb.mxu1 %v119_v27 }
  0x29   :  { %259 = vmatmul.f32.vlgmr.msrb.gmra.mxu2 %v120_v22  ;;  %219 = vmatmul.f32.vlgmr.msrb.gmra.mxu0 %v118_v23 }
  0x2a   :  { %239 = vmatmul.f32.vlgmr.msrb.gmra.mxu1 %v119_v27 }
  0x2b   :  { %279 = vmatmul.f32.vlgmr.msrb.gmra.mxu3 %v121_v26 }
  0x9e   :  { %v140_v29 = vpop.f32.mrf.mxu0 }
  0x9f   :  { %v160_v30 = vpop.f32.mrf.mxu1 }
  0xa0   :  { %v161_v31 = vadd.f32 %v160_v30, %v140_v29 }
  0xa4   :  { %v180_v32 = vpop.f32.mrf.mxu2 }
  0xa5   :  { %v181_v33 = vadd.f32 %v180_v32, %v161_v31 }
  0xa6   :  { %v200_v34 = vpop.f32.mrf.mxu3  ;;  %v220_v35 = vpop.f32.mrf.mxu0 }
  0xa7   :  { %v201_v36 = vadd.f32 %v200_v34, %v181_v33  ;;  %v240_v37 = vpop.f32.mrf.mxu1 }
  0xa9   :  { %v221_v38 = vadd.f32 %v220_v35, %v201_v36 }
  0xab   :  { %v241_v39 = vadd.f32 %v240_v37, %v221_v38 }
  0xac   :  { %v260_v40 = vpop.f32.mrf.mxu2 }
  0xad   :  { %v261_v41 = vadd.f32 %v260_v40, %v241_v39 }
  0xae   :  { %v280_v43 = vpop.f32.mrf.mxu3 }
  0xaf   :  { %v281_v44 = vadd.f32 %v280_v43, %v261_v41 }
  0xb1   :  { %v283_v45 = vadd.f32 %v281_v44, %v122_v42 }
  0xb3   :  { %285 = vst.msk [vmem:[#allocation7] sm:$0xf] %vm64_vm1, %v283_v45 }
  0xb4   :  { %296 = dma.vmem_to_hbm [thread:$0]  %s292_s1, 64, %s294_s21, [#allocation4]  }
  0xb5   :  { %388 = dma.done.wait [#allocation4], 64  }
  0xb6   :  { %389 = vsyncadd [#allocation4], 4294967232 }
  0xb7   :  { %301 = vsyncpa [#allocation3], 1 }
  0xb8   :  { %302 = vsyncpa [#allocation6], 1 }
  0xb9   :  { %303 = vsyncpa [#allocation4], 1 }

</bundles_post_ra>
